<compile_context>
chip_gen: v7x
topology: tpu7x:2x2x1
jax: 0.10.0
libtpu: 0.0.40
codegen_flags: <defaults>
</compile_context>

<pallas_src>
import jax
import jax.numpy as jnp
from jax.experimental import pallas as pl
from jax.experimental.pallas import tpu as pltpu


def _round_up(n, m):
    return ((n + m - 1) // m) * m


def _cdiv(a, b):
    return -(-a // b)


def _mlp_kernel(x_ref, w1_ref, b1_ref, w2_ref, b2_ref, w3_ref, b3_ref, o_ref):
    # Fused hot path for one batch tile: 3 matmuls + 2 ReLUs, all in VMEM.
    # x arrives in f32; the f32->bf16 cast runs on the VPU inside the kernel
    # (free filler under the MXU) instead of a separate XLA pad/cast HBM pass.
    x = x_ref[...].astype(jnp.bfloat16)                               # (TB, Dp)
    h = jnp.dot(x, w1_ref[...], preferred_element_type=jnp.float32) + b1_ref[...]
    h = jnp.maximum(h, 0.0)
    h = jnp.dot(h.astype(jnp.bfloat16), w2_ref[...],
                preferred_element_type=jnp.float32) + b2_ref[...]
    h = jnp.maximum(h, 0.0)
    o = jnp.dot(h.astype(jnp.bfloat16), w3_ref[...],
                preferred_element_type=jnp.float32) + b3_ref[...]
    o_ref[...] = o.astype(o_ref.dtype)


def neural_net_forward(x, params, *, out_dtype=jnp.float32):
    """x: (B, input_size) f32. params: w1,b1,w2,b2,w3,b3.

    wN: (in_features, out_features)  (pre-transposed PyTorch Linear weight)
    bN: (1, out_features)
    out_dtype: jnp.float32 (PyTorch-equivalent, default) or jnp.bfloat16
               (halves output HBM writeback if the consumer tolerates it).
    """
    w1, b1 = params["w1"], params["b1"]
    w2, b2 = params["w2"], params["b2"]
    w3, b3 = params["w3"], params["b3"]

    B, d_in = x.shape
    d_out = w3.shape[1]
    out_itemsize = jnp.dtype(out_dtype).itemsize

    # Common padded feature width (module requires input_size == hidden_size,
    # so one 128-lane multiple covers all layers).  Do NOT pad above the
    # needed 128-multiple: the kernel is HBM-bound at these widths.
    d_pad = _round_up(max(d_in, w1.shape[1], w2.shape[1], d_out), 128)

    # ---- Batch tile sizing ------------------------------------------------
    # Hug B (avoid padding B=300 up to 512 etc.), cap at 1024 rows, and cap by
    # a VMEM budget that fits v7x's 64 MiB per-TC VMEM with headroom (each TC
    # holds a full weight copy under the "parallel" batch axis).
    MAX_TILE_B = 1024
    VMEM_BUDGET = 48 * 1024 * 1024
    n_tiles = _cdiv(B, MAX_TILE_B)
    tile_b = _round_up(_cdiv(B, n_tiles), 16)          # multiple of 16 (bf16 sublanes)
    resident = 3 * d_pad * d_pad * 2 + 3 * d_pad * 4   # bf16 weights + f32 biases
    # Per-row cost: double-buffered f32 x in, double-buffered out, plus ~3 f32
    # intermediate slabs of compiler scratch inside the kernel body.
    per_row = d_pad * (2 * 4 + 2 * out_itemsize + 3 * 4)
    cap_rows = max(16, ((VMEM_BUDGET - resident) // max(per_row, 1)) // 16 * 16)
    tile_b = max(16, min(tile_b, MAX_TILE_B, cap_rows))
    b_pad = _round_up(B, tile_b)
    grid = (b_pad // tile_b,)
    # TODO(synk): for d_pad large enough that 3*d_pad^2 bf16 weights no longer
    # fit the 48 MiB budget (v7x 64 MiB/TC), add a K/N grid axis with an f32
    # VMEM accumulator instead of keeping all three layers resident.

    # ---- Operand preparation (no x cast pass; pad only if needed) ---------
    def pad_w(w):
        return jnp.pad(
            w, ((0, d_pad - w.shape[0]), (0, d_pad - w.shape[1]))
        ).astype(jnp.bfloat16)

    def pad_b(b):
        return jnp.pad(b, ((0, 0), (0, d_pad - b.shape[1])))  # stays f32

    if (b_pad, d_pad) != (B, d_in):
        xp = jnp.pad(x, ((0, b_pad - B), (0, d_pad - d_in)))  # f32, no cast
    else:
        xp = x
    w1p, b1p = pad_w(w1), pad_b(b1)
    w2p, b2p = pad_w(w2), pad_b(b2)
    w3p, b3p = pad_w(w3), pad_b(b3)

    # Explicit scoped-VMEM limit: at least the 32 MiB v6e/v7x default (v5e's
    # default is only 16 MiB), at most v7x's 64 MiB physical per-TC VMEM.
    vmem_need = (2 * resident
                 + 2 * tile_b * d_pad * (4 + out_itemsize)
                 + 4 * tile_b * d_pad * 4
                 + (1 << 20))
    vmem_limit = int(min(64 * 1024 * 1024, max(32 * 1024 * 1024, vmem_need)))

    cost = pl.CostEstimate(
        flops=2 * 3 * b_pad * d_pad * d_pad,
        transcendentals=0,
        bytes_accessed=(b_pad * d_pad * 4            # x in (f32)
                        + 3 * d_pad * d_pad * 2      # weights (bf16)
                        + 3 * d_pad * 4              # biases (f32)
                        + b_pad * d_pad * out_itemsize),  # out
    )

    def build_call(single_buffer_weights):
        # Batch tiles stream through the auto-pipeline; weights/biases are
        # pinned to block (0, 0) so they stay VMEM-resident across grid steps.
        inv_kw = (dict(pipeline_mode=pl.Buffered(1))
                  if single_buffer_weights else {})
        x_spec = pl.BlockSpec((tile_b, d_pad), lambda i: (i, 0))
        w_spec = pl.BlockSpec((d_pad, d_pad), lambda i: (0, 0), **inv_kw)
        b_spec = pl.BlockSpec((1, d_pad), lambda i: (0, 0), **inv_kw)
        o_spec = pl.BlockSpec((tile_b, d_pad), lambda i: (i, 0))
        return pl.pallas_call(
            _mlp_kernel,
            out_shape=jax.ShapeDtypeStruct((b_pad, d_pad), out_dtype),
            grid_spec=pltpu.PrefetchScalarGridSpec(
                num_scalar_prefetch=0,
                grid=grid,
                in_specs=[x_spec, w_spec, b_spec, w_spec, b_spec, w_spec, b_spec],
                out_specs=o_spec,
            ),
            compiler_params=pltpu.CompilerParams(
                dimension_semantics=("parallel",),   # v7x: shard batch over 2 TCs
                vmem_limit_bytes=vmem_limit,
            ),
            cost_estimate=cost,
        )

    try:
        # Single-buffer the grid-invariant weights/biases (halves resident
        # weight VMEM: 3*d_pad^2 bf16 instead of 6*d_pad^2).
        out_pad = build_call(True)(xp, w1p, b1p, w2p, b2p, w3p, b3p)
    except Exception:
        # Fallback for jax versions where pipeline_mode=pl.Buffered is not
        # supported on top-level TPU BlockSpecs; correctness is identical.
        out_pad = build_call(False)(xp, w1p, b1p, w2p, b2p, w3p, b3p)

    # Only emit the (HBM read+write) slice pass when padding actually happened.
    if (b_pad, d_pad) != (B, d_out):
        return out_pad[:B, :d_out]
    return out_pad


def init_params(key, input_size, hidden_size):
    """Deterministic PyTorch-Linear-style init (uniform +/- 1/sqrt(fan_in))."""
    ks = jax.random.split(key, 6)
    bound = 1.0 / jnp.sqrt(jnp.float32(input_size))

    def lin(kw, kb):
        # PyTorch stores weight as (out, in); we keep it transposed (in, out).
        w = jax.random.uniform(kw, (input_size, hidden_size), jnp.float32, -bound, bound)
        b = jax.random.uniform(kb, (1, hidden_size), jnp.float32, -bound, bound)
        return w, b

    w1, b1 = lin(ks[0], ks[1])
    w2, b2 = lin(ks[2], ks[3])
    w3, b3 = lin(ks[4], ks[5])
    return dict(w1=w1, b1=b1, w2=w2, b2=b2, w3=w3, b3=b3)


def _ref_forward_bf16(x, params):
    # Same math as the kernel (bf16 matmul inputs, f32 accumulate/elementwise).
    def lin(a, w, b):
        return jnp.dot(a.astype(jnp.bfloat16), w.astype(jnp.bfloat16),
                       preferred_element_type=jnp.float32) + b
    h = jnp.maximum(lin(x, params["w1"], params["b1"]), 0.0)
    h = jnp.maximum(lin(h, params["w2"], params["b2"]), 0.0)
    return lin(h, params["w3"], params["b3"])


def _ref_forward_f32(x, params):
    h = jnp.maximum(x @ params["w1"] + params["b1"], 0.0)
    h = jnp.maximum(h @ params["w2"] + params["b2"], 0.0)
    return h @ params["w3"] + params["b3"]


if __name__ == "__main__":
    # The module's forward only type-checks when input_size == hidden_size.
    batch = 2
    input_size = 32
    hidden_size = 32

    key = jax.random.PRNGKey(0)
    kx, kp = jax.random.split(key)
    x = jax.random.normal(kx, (batch, input_size), jnp.float32)
    params = init_params(kp, input_size, hidden_size)

    out = neural_net_forward(x, params)
    out = jax.block_until_ready(out)
    assert out.shape == (batch, hidden_size)
    assert out.dtype == jnp.float32

    # Tight check vs a plain-JAX reference using the same bf16-matmul math.
    ref_bf16 = _ref_forward_bf16(x, params)
    assert jnp.allclose(out, ref_bf16, atol=1e-4, rtol=1e-4)

    # Looser sanity check vs the full-f32 PyTorch-equivalent math.
    ref_f32 = _ref_forward_f32(x, params)
    assert jnp.allclose(out, ref_f32, atol=5e-2, rtol=5e-2)

    print("KERNEL_OK")
</pallas_src>

<mosaic_0001>
module attributes {stable_mosaic.version = 11 : i64} {
  func.func @_mlp_kernel(%arg0: i32, %arg1: memref<16x128xf32, #tpu.memory_space<vmem>>, %arg2: memref<128x128xbf16, #tpu.memory_space<vmem>>, %arg3: memref<1x128xf32, #tpu.memory_space<vmem>>, %arg4: memref<128x128xbf16, #tpu.memory_space<vmem>>, %arg5: memref<1x128xf32, #tpu.memory_space<vmem>>, %arg6: memref<128x128xbf16, #tpu.memory_space<vmem>>, %arg7: memref<1x128xf32, #tpu.memory_space<vmem>>, %arg8: memref<16x128xf32, #tpu.memory_space<vmem>>) attributes {dimension_semantics = [#tpu.dimension_semantics<parallel>], iteration_bounds = array<i64: 1>, scalar_prefetch = 0 : i64, scratch_operands = 0 : i64, tpu.core_type = #tpu.core_type<tc>, window_params = [{transform_indices = @transform_0, window_bounds = array<i64: 16, 128>}, {pipeline_mode = #tpu.pipeline_mode<synchronous>, transform_indices = @transform_1, window_bounds = array<i64: 128, 128>}, {pipeline_mode = #tpu.pipeline_mode<synchronous>, transform_indices = @transform_2, window_bounds = array<i64: 1, 128>}, {pipeline_mode = #tpu.pipeline_mode<synchronous>, transform_indices = @transform_3, window_bounds = array<i64: 128, 128>}, {pipeline_mode = #tpu.pipeline_mode<synchronous>, transform_indices = @transform_4, window_bounds = array<i64: 1, 128>}, {pipeline_mode = #tpu.pipeline_mode<synchronous>, transform_indices = @transform_5, window_bounds = array<i64: 128, 128>}, {pipeline_mode = #tpu.pipeline_mode<synchronous>, transform_indices = @transform_6, window_bounds = array<i64: 1, 128>}, {transform_indices = @transform_7, window_bounds = array<i64: 16, 128>}]} {
    %c0 = arith.constant 0 : index
    %c0_0 = arith.constant 0 : index
    %0 = vector.load %arg1[%c0, %c0_0] : memref<16x128xf32, #tpu.memory_space<vmem>>, vector<16x128xf32>
    %1 = arith.truncf %0 : vector<16x128xf32> to vector<16x128xbf16>
    %c0_1 = arith.constant 0 : index
    %c0_2 = arith.constant 0 : index
    %2 = vector.load %arg2[%c0_1, %c0_2] : memref<128x128xbf16, #tpu.memory_space<vmem>>, vector<128x128xbf16>
    %cst = arith.constant dense<0.000000e+00> : vector<16x128xf32>
    %3 = tpu.matmul %1, %2, %cst {dimension_numbers = #tpu.dot_dimension_numbers<[1], [0], [0], [1], [0, 0, 1, 1], [], []>} : vector<16x128xbf16>, vector<128x128xbf16>, vector<16x128xf32> -> vector<16x128xf32>
    %c0_3 = arith.constant 0 : index
    %c0_4 = arith.constant 0 : index
    %4 = vector.load %arg3[%c0_3, %c0_4] : memref<1x128xf32, #tpu.memory_space<vmem>>, vector<1x128xf32>
    %5 = vector.broadcast %4 : vector<1x128xf32> to vector<16x128xf32>
    %6 = arith.addf %3, %5 : vector<16x128xf32>
    %cst_5 = arith.constant 0.000000e+00 : f32
    %7 = vector.broadcast %cst_5 : f32 to vector<16x128xf32>
    %8 = arith.maximumf %6, %7 : vector<16x128xf32>
    %9 = arith.truncf %8 : vector<16x128xf32> to vector<16x128xbf16>
    %c0_6 = arith.constant 0 : index
    %c0_7 = arith.constant 0 : index
    %10 = vector.load %arg4[%c0_6, %c0_7] : memref<128x128xbf16, #tpu.memory_space<vmem>>, vector<128x128xbf16>
    %cst_8 = arith.constant dense<0.000000e+00> : vector<16x128xf32>
    %11 = tpu.matmul %9, %10, %cst_8 {dimension_numbers = #tpu.dot_dimension_numbers<[1], [0], [0], [1], [0, 0, 1, 1], [], []>} : vector<16x128xbf16>, vector<128x128xbf16>, vector<16x128xf32> -> vector<16x128xf32>
    %c0_9 = arith.constant 0 : index
    %c0_10 = arith.constant 0 : index
    %12 = vector.load %arg5[%c0_9, %c0_10] : memref<1x128xf32, #tpu.memory_space<vmem>>, vector<1x128xf32>
    %13 = vector.broadcast %12 : vector<1x128xf32> to vector<16x128xf32>
    %14 = arith.addf %11, %13 : vector<16x128xf32>
    %cst_11 = arith.constant 0.000000e+00 : f32
    %15 = vector.broadcast %cst_11 : f32 to vector<16x128xf32>
    %16 = arith.maximumf %14, %15 : vector<16x128xf32>
    %17 = arith.truncf %16 : vector<16x128xf32> to vector<16x128xbf16>
    %c0_12 = arith.constant 0 : index
    %c0_13 = arith.constant 0 : index
    %18 = vector.load %arg6[%c0_12, %c0_13] : memref<128x128xbf16, #tpu.memory_space<vmem>>, vector<128x128xbf16>
    %cst_14 = arith.constant dense<0.000000e+00> : vector<16x128xf32>
    %19 = tpu.matmul %17, %18, %cst_14 {dimension_numbers = #tpu.dot_dimension_numbers<[1], [0], [0], [1], [0, 0, 1, 1], [], []>} : vector<16x128xbf16>, vector<128x128xbf16>, vector<16x128xf32> -> vector<16x128xf32>
    %c0_15 = arith.constant 0 : index
    %c0_16 = arith.constant 0 : index
    %20 = vector.load %arg7[%c0_15, %c0_16] : memref<1x128xf32, #tpu.memory_space<vmem>>, vector<1x128xf32>
    %21 = vector.broadcast %20 : vector<1x128xf32> to vector<16x128xf32>
    %22 = arith.addf %19, %21 : vector<16x128xf32>
    %c0_17 = arith.constant 0 : index
    %c0_18 = arith.constant 0 : index
    %23 = vector.load %arg8[%c0_17, %c0_18] : memref<16x128xf32, #tpu.memory_space<vmem>>, vector<16x128xf32>
    tpu.vector_store %arg8[%c0_17, %c0_18], %22 {strides = array<i32>} : memref<16x128xf32, #tpu.memory_space<vmem>>, vector<16x128xf32>,
    return
  }
  func.func @transform_0(%arg0: i32) -> (i32, i32) {
    %c0_i32 = arith.constant 0 : i32
    %c0_i32_0 = arith.constant 0 : i32
    return %arg0, %c0_i32 : i32, i32
  }
  func.func @transform_1(%arg0: i32) -> (i32, i32) {
    %c0_i32 = arith.constant 0 : i32
    %c0_i32_0 = arith.constant 0 : i32
    %c0_i32_1 = arith.constant 0 : i32
    return %c0_i32, %c0_i32_0 : i32, i32
  }
  func.func @transform_2(%arg0: i32) -> (i32, i32) {
    %c0_i32 = arith.constant 0 : i32
    %c0_i32_0 = arith.constant 0 : i32
    %c0_i32_1 = arith.constant 0 : i32
    return %c0_i32, %c0_i32_0 : i32, i32
  }
  func.func @transform_3(%arg0: i32) -> (i32, i32) {
    %c0_i32 = arith.constant 0 : i32
    %c0_i32_0 = arith.constant 0 : i32
    %c0_i32_1 = arith.constant 0 : i32
    return %c0_i32, %c0_i32_0 : i32, i32
  }
  func.func @transform_4(%arg0: i32) -> (i32, i32) {
    %c0_i32 = arith.constant 0 : i32
    %c0_i32_0 = arith.constant 0 : i32
    %c0_i32_1 = arith.constant 0 : i32
    return %c0_i32, %c0_i32_0 : i32, i32
  }
  func.func @transform_5(%arg0: i32) -> (i32, i32) {
    %c0_i32 = arith.constant 0 : i32
    %c0_i32_0 = arith.constant 0 : i32
    %c0_i32_1 = arith.constant 0 : i32
    return %c0_i32, %c0_i32_0 : i32, i32
  }
  func.func @transform_6(%arg0: i32) -> (i32, i32) {
    %c0_i32 = arith.constant 0 : i32
    %c0_i32_0 = arith.constant 0 : i32
    %c0_i32_1 = arith.constant 0 : i32
    return %c0_i32, %c0_i32_0 : i32, i32
  }
  func.func @transform_7(%arg0: i32) -> (i32, i32) {
    %c0_i32 = arith.constant 0 : i32
    %c0_i32_0 = arith.constant 0 : i32
    return %arg0, %c0_i32 : i32, i32
  }
}

module attributes {stable_mosaic.version = 11 : i64} {
  func.func @_mlp_kernel(%arg0: i32, %arg1: memref<16x128xf32, #tpu.memory_space<vmem>>, %arg2: memref<128x128xbf16, #tpu.memory_space<vmem>>, %arg3: memref<1x128xf32, #tpu.memory_space<vmem>>, %arg4: memref<128x128xbf16, #tpu.memory_space<vmem>>, %arg5: memref<1x128xf32, #tpu.memory_space<vmem>>, %arg6: memref<128x128xbf16, #tpu.memory_space<vmem>>, %arg7: memref<1x128xf32, #tpu.memory_space<vmem>>, %arg8: memref<16x128xf32, #tpu.memory_space<vmem>>) attributes {dimension_semantics = [#tpu.dimension_semantics<parallel>], iteration_bounds = array<i64: 1>, scalar_prefetch = 0 : i64, scratch_operands = 0 : i64, tpu.core_type = #tpu.core_type<tc>, window_params = [{transform_indices = @transform_0, window_bounds = array<i64: 16, 128>}, {pipeline_mode = #tpu.pipeline_mode<synchronous>, transform_indices = @transform_1, window_bounds = array<i64: 128, 128>}, {pipeline_mode = #tpu.pipeline_mode<synchronous>, transform_indices = @transform_2, window_bounds = array<i64: 1, 128>}, {pipeline_mode = #tpu.pipeline_mode<synchronous>, transform_indices = @transform_3, window_bounds = array<i64: 128, 128>}, {pipeline_mode = #tpu.pipeline_mode<synchronous>, transform_indices = @transform_4, window_bounds = array<i64: 1, 128>}, {pipeline_mode = #tpu.pipeline_mode<synchronous>, transform_indices = @transform_5, window_bounds = array<i64: 128, 128>}, {pipeline_mode = #tpu.pipeline_mode<synchronous>, transform_indices = @transform_6, window_bounds = array<i64: 1, 128>}, {transform_indices = @transform_7, window_bounds = array<i64: 16, 128>}]} {
    %c0 = arith.constant 0 : index
    %c0_0 = arith.constant 0 : index
    %0 = vector.load %arg1[%c0, %c0_0] : memref<16x128xf32, #tpu.memory_space<vmem>>, vector<16x128xf32>
    %1 = arith.truncf %0 : vector<16x128xf32> to vector<16x128xbf16>
    %c0_1 = arith.constant 0 : index
    %c0_2 = arith.constant 0 : index
    %2 = vector.load %arg2[%c0_1, %c0_2] : memref<128x128xbf16, #tpu.memory_space<vmem>>, vector<128x128xbf16>
    %cst = arith.constant dense<0.000000e+00> : vector<16x128xf32>
    %3 = tpu.matmul %1, %2, %cst {dimension_numbers = #tpu.dot_dimension_numbers<[1], [0], [0], [1], [0, 0, 1, 1], [], []>} : vector<16x128xbf16>, vector<128x128xbf16>, vector<16x128xf32> -> vector<16x128xf32>
    %c0_3 = arith.constant 0 : index
    %c0_4 = arith.constant 0 : index
    %4 = vector.load %arg3[%c0_3, %c0_4] : memref<1x128xf32, #tpu.memory_space<vmem>>, vector<1x128xf32>
    %5 = vector.broadcast %4 : vector<1x128xf32> to vector<16x128xf32>
    %6 = arith.addf %3, %5 : vector<16x128xf32>
    %cst_5 = arith.constant 0.000000e+00 : f32
    %7 = vector.broadcast %cst_5 : f32 to vector<16x128xf32>
    %8 = arith.maximumf %6, %7 : vector<16x128xf32>
    %9 = arith.truncf %8 : vector<16x128xf32> to vector<16x128xbf16>
    %c0_6 = arith.constant 0 : index
    %c0_7 = arith.constant 0 : index
    %10 = vector.load %arg4[%c0_6, %c0_7] : memref<128x128xbf16, #tpu.memory_space<vmem>>, vector<128x128xbf16>
    %cst_8 = arith.constant dense<0.000000e+00> : vector<16x128xf32>
    %11 = tpu.matmul %9, %10, %cst_8 {dimension_numbers = #tpu.dot_dimension_numbers<[1], [0], [0], [1], [0, 0, 1, 1], [], []>} : vector<16x128xbf16>, vector<128x128xbf16>, vector<16x128xf32> -> vector<16x128xf32>
    %c0_9 = arith.constant 0 : index
    %c0_10 = arith.constant 0 : index
    %12 = vector.load %arg5[%c0_9, %c0_10] : memref<1x128xf32, #tpu.memory_space<vmem>>, vector<1x128xf32>
    %13 = vector.broadcast %12 : vector<1x128xf32> to vector<16x128xf32>
    %14 = arith.addf %11, %13 : vector<16x128xf32>
    %cst_11 = arith.constant 0.000000e+00 : f32
    %15 = vector.broadcast %cst_11 : f32 to vector<16x128xf32>
    %16 = arith.maximumf %14, %15 : vector<16x128xf32>
    %17 = arith.truncf %16 : vector<16x128xf32> to vector<16x128xbf16>
    %c0_12 = arith.constant 0 : index
    %c0_13 = arith.constant 0 : index
    %18 = vector.load %arg6[%c0_12, %c0_13] : memref<128x128xbf16, #tpu.memory_space<vmem>>, vector<128x128xbf16>
    %cst_14 = arith.constant dense<0.000000e+00> : vector<16x128xf32>
    %19 = tpu.matmul %17, %18, %cst_14 {dimension_numbers = #tpu.dot_dimension_numbers<[1], [0], [0], [1], [0, 0, 1, 1], [], []>} : vector<16x128xbf16>, vector<128x128xbf16>, vector<16x128xf32> -> vector<16x128xf32>
    %c0_15 = arith.constant 0 : index
    %c0_16 = arith.constant 0 : index
    %20 = vector.load %arg7[%c0_15, %c0_16] : memref<1x128xf32, #tpu.memory_space<vmem>>, vector<1x128xf32>
    %21 = vector.broadcast %20 : vector<1x128xf32> to vector<16x128xf32>
    %22 = arith.addf %19, %21 : vector<16x128xf32>
    %c0_17 = arith.constant 0 : index
    %c0_18 = arith.constant 0 : index
    %23 = vector.load %arg8[%c0_17, %c0_18] : memref<16x128xf32, #tpu.memory_space<vmem>>, vector<16x128xf32>
    tpu.vector_store %arg8[%c0_17, %c0_18], %22 {strides = array<i32>} : memref<16x128xf32, #tpu.memory_space<vmem>>, vector<16x128xf32>,
    return
  }
  func.func @transform_0(%arg0: i32) -> (i32, i32) {
    %c0_i32 = arith.constant 0 : i32
    %c0_i32_0 = arith.constant 0 : i32
    return %arg0, %c0_i32 : i32, i32
  }
  func.func @transform_1(%arg0: i32) -> (i32, i32) {
    %c0_i32 = arith.constant 0 : i32
    %c0_i32_0 = arith.constant 0 : i32
    %c0_i32_1 = arith.constant 0 : i32
    return %c0_i32, %c0_i32_0 : i32, i32
  }
  func.func @transform_2(%arg0: i32) -> (i32, i32) {
    %c0_i32 = arith.constant 0 : i32
    %c0_i32_0 = arith.constant 0 : i32
    %c0_i32_1 = arith.constant 0 : i32
    return %c0_i32, %c0_i32_0 : i32, i32
  }
  func.func @transform_3(%arg0: i32) -> (i32, i32) {
    %c0_i32 = arith.constant 0 : i32
    %c0_i32_0 = arith.constant 0 : i32
    %c0_i32_1 = arith.constant 0 : i32
    return %c0_i32, %c0_i32_0 : i32, i32
  }
  func.func @transform_4(%arg0: i32) -> (i32, i32) {
    %c0_i32 = arith.constant 0 : i32
    %c0_i32_0 = arith.constant 0 : i32
    %c0_i32_1 = arith.constant 0 : i32
    return %c0_i32, %c0_i32_0 : i32, i32
  }
  func.func @transform_5(%arg0: i32) -> (i32, i32) {
    %c0_i32 = arith.constant 0 : i32
    %c0_i32_0 = arith.constant 0 : i32
    %c0_i32_1 = arith.constant 0 : i32
    return %c0_i32, %c0_i32_0 : i32, i32
  }
  func.func @transform_6(%arg0: i32) -> (i32, i32) {
    %c0_i32 = arith.constant 0 : i32
    %c0_i32_0 = arith.constant 0 : i32
    %c0_i32_1 = arith.constant 0 : i32
    return %c0_i32, %c0_i32_0 : i32, i32
  }
  func.func @transform_7(%arg0: i32) -> (i32, i32) {
    %c0_i32 = arith.constant 0 : i32
    %c0_i32_0 = arith.constant 0 : i32
    return %arg0, %c0_i32 : i32, i32
  }
}

</mosaic_0001>

<bundles_post_ra>
// kernel: tpu_custom_call.1
= control target key start
LH: loop header
LB: loop body
LE: loop exit
PB: predicated region body
PF: predicated region fallthrough
CT: control target
= control target key end

     0   :  { %12 = vsyncpa [#allocation3], 0  ;;  %s888_s0 = inlined_call_operand.hbm [shape: f32[16,128], index: 0, kind: input, shape index: {}]   ;;  %s889_s1 = inlined_call_operand.hbm [shape: bf16[128,128], index: 1, kind: input, shape index: {}]   ;;  %s890_s2 = inlined_call_operand.vmem [shape: f32[1,128], index: 2, kind: input, shape index: {}]   ;;  %s891_s3 = inlined_call_operand.hbm [shape: bf16[128,128], index: 3, kind: input, shape index: {}]   ;;  %s892_s4 = inlined_call_operand.vmem [shape: f32[1,128], index: 4, kind: input, shape index: {}]   ;;  %s893_s5 = inlined_call_operand.hbm [shape: bf16[128,128], index: 5, kind: input, shape index: {}]   ;;  %s894_s6 = inlined_call_operand.vmem [shape: f32[1,128], index: 6, kind: input, shape index: {}]   ;;  %s895_s7 = inlined_call_operand.hbm [shape: f32[16,128], index: 7, kind: output, shape index: {}]  }
   0x1   :  { %13 = vsyncpa [#allocation6], 0 }
   0x2   :  { %14 = vsyncpa [#allocation9], 0 }
   0x3   :  { %15 = vsyncpa [#allocation4], 0  ;;  %s716_s24 = smov [#allocation5]   ;;  %s598_s28 = scalar_lea.hbm %s889_s1, 1024 }
   0x4   :  { %s33_s25 = sshll.u32 %s716_s24, 4  ;;  %p599_p0 = scmp.ne.s32.totalorder %s889_s1, %s598_s28  ;;  %s34_s25 = int_to_ptr.vmem [resolvable:$true] %s33_s25 }
   0x5   :  { %p602_p1 = scmp.lt.u32.totalorder %s598_s28, %s889_s1 }
   0x7   :  { %p604_p2 = pnand %p602_p1, %p599_p0 }
   0x9   :  { %607 = shalt.err (!%p604_p2)
}
   0xa   :  { %s608_s10 = scalar_lea.vmem %s34_s25, 1024  ;;  %p613_p4 = scmp.lt.s32.totalorder %s34_s25, %s34_s25 }
   0xb   :  { %p609_p3 = scmp.ne.s32.totalorder %s34_s25, %s608_s10  ;;  %p614_p5 = scmp.lt.s32.totalorder %s608_s10, %s608_s10 }
   0xd   :  { %p615_p6 = por %p614_p5, %p613_p4 }
   0xf   :  { %p616_p7 = pnand %p615_p6, %p609_p3 }
  0x11   :  { %619 = shalt.err (!%p616_p7)
}
  0x12   :  { %s717_s11 = smov 64   ;;  %s718_s12 = smov 4  }
  0x13   :  { %39 = dma.hbm_to_vmem [thread:$0]  %s889_s1, 1024, %s34_s25, [#allocation6], %s717_s11, %s717_s11, %s718_s12  }
  0x14   :  { %s719_s15 = smov [#allocation2]   ;;  %s620_s19 = scalar_lea.hbm %s888_s0, 256 }
  0x15   :  { %s21_s16 = sshll.u32 %s719_s15, 4  ;;  %p621_p8 = scmp.ne.s32.totalorder %s888_s0, %s620_s19  ;;  %s22_s16 = int_to_ptr.vmem [resolvable:$true] %s21_s16 }
  0x16   :  { %p624_p9 = scmp.lt.u32.totalorder %s620_s19, %s888_s0 }
  0x18   :  { %p626_p10 = pnand %p624_p9, %p621_p8 }
  0x1a   :  { %629 = shalt.err (!%p626_p10)
}
  0x1b   :  { %s630_s24 = scalar_lea.vmem %s22_s16, 256  ;;  %p635_p12 = scmp.lt.s32.totalorder %s22_s16, %s22_s16 }
  0x1c   :  { %p631_p11 = scmp.ne.s32.totalorder %s22_s16, %s630_s24  ;;  %p636_p13 = scmp.lt.s32.totalorder %s630_s24, %s630_s24 }
  0x1e   :  { %p637_p0 = por %p636_p13, %p635_p12 }
  0x20   :  { %p638_p1 = pnand %p637_p0, %p631_p11 }
  0x22   :  { %641 = shalt.err (!%p638_p1)
}
  0x23   :  { %s720_s1 = smov 128   ;;  %s721_s25 = smov 8  }
  0x24   :  { %27 = dma.hbm_to_vmem [thread:$0]  %s888_s0, 256, %s22_s16, [#allocation3], %s720_s1, %s720_s1, %s721_s25  }
  0x25   :  { %s722_s28 = smov [#allocation7]   ;;  %s723_s30 = smov [#allocation8]  }
  0x26   :  { %s47_s29 = sshll.u32 %s722_s28, 4  ;;  %s61_s8 = sshll.u32 %s723_s30, 4  ;;  %s48_s29 = int_to_ptr.vmem [resolvable:$true] %s47_s29  ;;  %s797_s8 = int_to_ptr.vmem [resolvable:$true] %s61_s8 }
  0x27   :  { %s642_s13 = scalar_lea.hbm %s891_s3, 1024 }
  0x28   :  { %p643_p2 = scmp.ne.s32.totalorder %s891_s3, %s642_s13  ;;  %p646_p3 = scmp.lt.u32.totalorder %s642_s13, %s891_s3 }
  0x2a   :  { %p648_p4 = pnand %p646_p3, %p643_p2 }
  0x2c   :  { %651 = shalt.err (!%p648_p4)
}
  0x2d   :  { %s652_s0 = scalar_lea.vmem %s48_s29, 1024  ;;  %p657_p6 = scmp.lt.s32.totalorder %s48_s29, %s48_s29 }
  0x2e   :  { %p653_p5 = scmp.ne.s32.totalorder %s48_s29, %s652_s0  ;;  %p658_p7 = scmp.lt.s32.totalorder %s652_s0, %s652_s0 }
  0x30   :  { %p659_p8 = por %p658_p7, %p657_p6 }
  0x32   :  { %p660_p9 = pnand %p659_p8, %p653_p5 }
  0x34   :  { %663 = shalt.err (!%p660_p9)
}
  0x35   :  { %53 = dma.hbm_to_vmem [thread:$0]  %s891_s3, 1024, %s48_s29, [#allocation6], %s717_s11, %s717_s11, %s718_s12  }
  0x36   :  { %s664_s22 = scalar_lea.hbm %s893_s5, 1024 }
  0x37   :  { %p665_p10 = scmp.ne.s32.totalorder %s893_s5, %s664_s22  ;;  %p668_p11 = scmp.lt.u32.totalorder %s664_s22, %s893_s5 }
  0x39   :  { %p670_p12 = pnand %p668_p11, %p665_p10 }
  0x3b   :  { %673 = shalt.err (!%p670_p12)
}
  0x3c   :  { %s674_s28 = scalar_lea.vmem %s797_s8, 1024  ;;  %p679_p0 = scmp.lt.s32.totalorder %s797_s8, %s797_s8 }
  0x3d   :  { %p675_p13 = scmp.ne.s32.totalorder %s797_s8, %s674_s28  ;;  %p680_p1 = scmp.lt.s32.totalorder %s674_s28, %s674_s28 }
  0x3f   :  { %p681_p2 = por %p680_p1, %p679_p0 }
  0x41   :  { %p682_p3 = pnand %p681_p2, %p675_p13 }
  0x43   :  { %685 = shalt.err (!%p682_p3)
}
  0x44   :  { %67 = dma.hbm_to_vmem [thread:$0]  %s893_s5, 1024, %s797_s8, [#allocation9], %s717_s11, %s717_s11, %s718_s12  }
  0x45   :  { %708 = dma.done.wait [#allocation3], 256  }
  0x46   :  { %709 = vsyncadd [#allocation3], 4294967040 }
  0x47   :  { %710 = dma.done.wait [#allocation6], 2048  }
  0x48   :  { %711 = vsyncadd [#allocation6], 4294965248 }
  0x49   :  { %712 = dma.done.wait [#allocation9], 1024  }
  0x4a   :  { %713 = vsyncadd [#allocation9], 4294966272  ;;  %v724_v0 = vmov 0.0   ;;  %vm725_vm0 = vmmov 0   ;;  %v574_v1 = vld [vmem:[#allocation5] sm:$0xff]   ;;  %v575_v2 = vld [vmem:[#allocation5 + $0x8] sm:$0xff]  }
  0x4b   :  { %503 = vmatprep.subr.bf16.mxu0 %v724_v0  ;;  %519 = vmatprep.mubr.msk.bf16.mxu0 %vm725_vm0, %v724_v0  ;;  %v576_v3 = vld [vmem:[#allocation5 + $0x10] sm:$0xff]   ;;  %v582_v4 = vld [vmem:[#allocation7] sm:$0xff]   ;;  %v577_v5 = vld [vmem:[#allocation5 + $0x18] sm:$0xff]   ;;  %s726_s9 = smov [#allocation10]  }
  0x4c   :  { %523 = vmatprep.subr.bf16.mxu1 %v724_v0  ;;  %539 = vmatprep.mubr.msk.bf16.mxu1 %vm725_vm0, %v724_v0  ;;  %v583_v6 = vld [vmem:[#allocation7 + $0x8] sm:$0xff]   ;;  %v578_v7 = vld [vmem:[#allocation5 + $0x20] sm:$0xff]   ;;  %v584_v8 = vld [vmem:[#allocation7 + $0x10] sm:$0xff]   ;;  %s435_s10 = sshll.u32 %s726_s9, 4  ;;  %s436_s10 = int_to_ptr.vmem [resolvable:$true] %s435_s10 }
  0x4d   :  { %504 = vmatpush3.bf16.msra.mxu0 %v574_v1  ;;  %524 = vmatpush3.bf16.msra.mxu1 %v582_v4  ;;  %v579_v9 = vld [vmem:[#allocation5 + $0x28] sm:$0xff]   ;;  %v585_v10 = vld [vmem:[#allocation7 + $0x18] sm:$0xff]   ;;  %v580_v11 = vld [vmem:[#allocation5 + $0x30] sm:$0xff]   ;;  %p691_p5 = scmp.lt.s32.totalorder %s436_s10, %s436_s10 }
  0x4e   :  { %505 = vmatprep.subr.bf16.mxu0 %v724_v0  ;;  %525 = vmatprep.subr.bf16.mxu1 %v724_v0  ;;  %v586_v12 = vld [vmem:[#allocation7 + $0x20] sm:$0xff]   ;;  %v581_v13 = vld [vmem:[#allocation5 + $0x38] sm:$0xff]   ;;  %v83_v14 = vld [vmem:[#allocation2] sm:$0xff] }
  0x4f   :  { %v84_v15 = vld [vmem:[#allocation2 + $0x8] sm:$0xff]  ;;  %v587_v16 = vld [vmem:[#allocation7 + $0x28] sm:$0xff]   ;;  %v588_v18 = vld [vmem:[#allocation7 + $0x30] sm:$0xff]  }
  0x50   :  { %v85_v17 = vpack.c.bf16 %v84_v15, %v83_v14  ;;  %v589_v19 = vld [vmem:[#allocation7 + $0x38] sm:$0xff]   ;;  %v590_v20 = vld [vmem:[#allocation8] sm:$0xff]   ;;  %v591_v21 = vld [vmem:[#allocation8 + $0x8] sm:$0xff]  }
  0x51   :  { %506 = vmatpush3.bf16.msra.mxu0 %v575_v2  ;;  %526 = vmatpush3.bf16.msra.mxu1 %v583_v6  ;;  %v592_v22 = vld [vmem:[#allocation8 + $0x10] sm:$0xff]   ;;  %v593_v23 = vld [vmem:[#allocation8 + $0x18] sm:$0xff]   ;;  %v594_v24 = vld [vmem:[#allocation8 + $0x20] sm:$0xff]  }
  0x52   :  { %507 = vmatprep.subr.bf16.mxu0 %v724_v0  ;;  %527 = vmatprep.subr.bf16.mxu1 %v724_v0  ;;  %v595_v25 = vld [vmem:[#allocation8 + $0x28] sm:$0xff]   ;;  %v449_v26 = vld [vmem:[%s890_s2] ss:$0 sm:$0xff]  ;;  %v597_v37 = vld [vmem:[#allocation8 + $0x38] sm:$0xff]  }
  0x53   :  { %v596_v36 = vld [vmem:[#allocation8 + $0x30] sm:$0xff]  }
  0x54   :  { %v458_v38 = vld [vmem:[%s892_s4] ss:$0 sm:$0xff]  ;;  %s686_s4 = scalar_lea.vmem %s436_s10, 256 }
  0x55   :  { %508 = vmatpush3.bf16.msra.mxu0 %v576_v3  ;;  %528 = vmatpush3.bf16.msra.mxu1 %v584_v8  ;;  %v467_v48 = vld [vmem:[%s894_s6] ss:$0 sm:$0xff]  ;;  %p687_p4 = scmp.ne.s32.totalorder %s436_s10, %s686_s4  ;;  %p692_p6 = scmp.lt.s32.totalorder %s686_s4, %s686_s4 }
  0x56   :  { %509 = vmatprep.subr.bf16.mxu0 %v724_v0  ;;  %529 = vmatprep.subr.bf16.mxu1 %v724_v0 }
  0x57   :  { %p693_p7 = por %p692_p6, %p691_p5 }
  0x59   :  { %510 = vmatpush3.bf16.msra.mxu0 %v577_v5  ;;  %530 = vmatpush3.bf16.msra.mxu1 %v585_v10  ;;  %p694_p8 = pnand %p693_p7, %p687_p4 }
  0x5a   :  { %511 = vmatprep.subr.bf16.mxu0 %v724_v0  ;;  %531 = vmatprep.subr.bf16.mxu1 %v724_v0 }
  0x5d   :  { %512 = vmatpush3.bf16.msra.mxu0 %v578_v7  ;;  %532 = vmatpush3.bf16.msra.mxu1 %v586_v12 }
  0x5e   :  { %513 = vmatprep.subr.bf16.mxu0 %v724_v0  ;;  %533 = vmatprep.subr.bf16.mxu1 %v724_v0 }
  0x61   :  { %514 = vmatpush3.bf16.msra.mxu0 %v579_v9  ;;  %534 = vmatpush3.bf16.msra.mxu1 %v587_v16 }
  0x62   :  { %515 = vmatprep.subr.bf16.mxu0 %v724_v0  ;;  %535 = vmatprep.subr.bf16.mxu1 %v724_v0 }
  0x65   :  { %516 = vmatpush3.bf16.msra.mxu0 %v580_v11  ;;  %536 = vmatpush3.bf16.msra.mxu1 %v588_v18 }
  0x66   :  { %517 = vmatprep.subr.bf16.mxu0 %v724_v0  ;;  %537 = vmatprep.subr.bf16.mxu1 %v724_v0 }
  0x69   :  { %518 = vmatpush3.bf16.msra.mxu0 %v581_v13  ;;  %538 = vmatpush3.bf16.msra.mxu1 %v589_v19 }
  0x6a   :  { %543 = vmatprep.subr.bf16.mxu0 %v724_v0 }
  0x6c   :  { %520 = vmatmul.mubr.bf16.vlgmr.msra.gmra.mrb[0].mxu0 %v85_v17 }
  0x6d   :  { %559 = vmatprep.mubr.msk.bf16.mxu0 %vm725_vm0, %v724_v0  ;;  %544 = vmatpush3.bf16.msra.mxu0 %v590_v20 }
  0x6e   :  { %545 = vmatprep.subr.bf16.mxu0 %v724_v0 }
  0x71   :  { %546 = vmatpush3.bf16.msra.mxu0 %v591_v21 }
  0x72   :  { %547 = vmatprep.subr.bf16.mxu0 %v724_v0 }
  0x75   :  { %548 = vmatpush3.bf16.msra.mxu0 %v592_v22 }
  0x76   :  { %549 = vmatprep.subr.bf16.mxu0 %v724_v0 }
  0x79   :  { %550 = vmatpush3.bf16.msra.mxu0 %v593_v23 }
  0x7a   :  { %551 = vmatprep.subr.bf16.mxu0 %v724_v0 }
  0x7d   :  { %552 = vmatpush3.bf16.msra.mxu0 %v594_v24 }
  0x7e   :  { %553 = vmatprep.subr.bf16.mxu0 %v724_v0 }
  0x81   :  { %554 = vmatpush3.bf16.msra.mxu0 %v595_v25 }
  0x82   :  { %555 = vmatprep.subr.bf16.mxu0 %v724_v0 }
  0x85   :  { %556 = vmatpush3.bf16.msra.mxu0 %v596_v36 }
  0x86   :  { %557 = vmatprep.subr.bf16.mxu0 %v724_v0 }
  0x89   :  { %558 = vmatpush3.bf16.msra.mxu0 %v597_v37 }
 0x13f   :  { %v191_v27 = vpop.f32.mrb[0].mxu0 }
 0x140   :  { %v192_v28 = vadd.f32 %v449_v26, %v191_v27  ;;  %v521_v29 = vpop.f32.mrb[1].mxu0 }
 0x141   :  { %v194_v30 = vpop.f32.mrb[2].mxu0 }
 0x142   :  { %v195_v31 = vadd.f32 %v449_v26, %v194_v30  ;;  %v522_v32 = vpop.f32.mrb[3].mxu0  ;;  %v198_v33 = vmax.f32 %v192_v28, 0.0 }
 0x144   :  { %v199_v34 = vmax.f32 %v195_v31, 0.0 }
 0x146   :  { %v200_v35 = vpack.c.bf16 %v199_v34, %v198_v33 }
 0x148   :  { %540 = vmatmul.mubr.bf16.vlgmr.msra.gmra.mrb[0].mxu1 %v200_v35 }
 0x21b   :  { %v306_v39 = vpop.f32.mrb[0].mxu1 }
 0x21c   :  { %v307_v40 = vadd.f32 %v458_v38, %v306_v39  ;;  %v541_v41 = vpop.f32.mrb[1].mxu1 }
 0x21d   :  { %v309_v42 = vpop.f32.mrb[2].mxu1 }
 0x21e   :  { %v310_v43 = vadd.f32 %v458_v38, %v309_v42  ;;  %v542_v44 = vpop.f32.mrb[3].mxu1  ;;  %v313_v45 = vmax.f32 %v307_v40, 0.0 }
 0x220   :  { %v314_v46 = vmax.f32 %v310_v43, 0.0 }
 0x222   :  { %v315_v47 = vpack.c.bf16 %v314_v46, %v313_v45 }
 0x224   :  { %560 = vmatmul.mubr.bf16.vlgmr.msra.gmra.mrb[4].mxu0 %v315_v47 }
 0x2f7   :  { %v421_v49 = vpop.f32.mrb[4].mxu0 }
 0x2f8   :  { %v422_v50 = vadd.f32 %v467_v48, %v421_v49  ;;  %v561_v51 = vpop.f32.mrb[5].mxu0 }
 0x2f9   :  { %v424_v52 = vpop.f32.mrb[6].mxu0 }
 0x2fa   :  { %428 = vst [vmem:[#allocation10] sm:$0xff] %v422_v50  ;;  %v425_v53 = vadd.f32 %v467_v48, %v424_v52  ;;  %v562_v54 = vpop.f32.mrb[7].mxu0 }
 0x2fc   :  { %429 = vst [vmem:[#allocation10 + $0x8] sm:$0xff] %v425_v53 }
 0x2fd   :  { %697 = shalt.err (!%p694_p8)
}
 0x2fe   :  { %s698_s14 = scalar_lea.hbm %s895_s7, 256 }
 0x2ff   :  { %p699_p9 = scmp.ne.s32.totalorder %s895_s7, %s698_s14  ;;  %p702_p10 = scmp.lt.u32.totalorder %s698_s14, %s895_s7 }
 0x301   :  { %p704_p11 = pnand %p702_p10, %p699_p9 }
 0x303   :  { %707 = shalt.err (!%p704_p11)
}
 0x304   :  { %441 = dma.vmem_to_hbm [thread:$0]  %s436_s10, 256, %s895_s7, [#allocation4], %s720_s1, %s720_s1, %s721_s25  }
 0x305   :  { %714 = dma.done.wait [#allocation4], 256  }
 0x306   :  { %715 = vsyncadd [#allocation4], 4294967040 }
 0x307   :  { %445 = vsyncpa [#allocation3], 1 }
 0x308   :  { %446 = vsyncpa [#allocation6], 1 }
 0x309   :  { %447 = vsyncpa [#allocation9], 1 }
 0x30a   :  { %448 = vsyncpa [#allocation4], 1 }

// kernel: tpu_custom_call.1
= control target key start
LH: loop header
LB: loop body
LE: loop exit
PB: predicated region body
PF: predicated region fallthrough
CT: control target
= control target key end

     0   :  { %12 = vsyncpa [#allocation3], 0  ;;  %s888_s0 = inlined_call_operand.hbm [shape: f32[16,128], index: 0, kind: input, shape index: {}]   ;;  %s889_s1 = inlined_call_operand.hbm [shape: bf16[128,128], index: 1, kind: input, shape index: {}]   ;;  %s890_s2 = inlined_call_operand.vmem [shape: f32[1,128], index: 2, kind: input, shape index: {}]   ;;  %s891_s3 = inlined_call_operand.hbm [shape: bf16[128,128], index: 3, kind: input, shape index: {}]   ;;  %s892_s4 = inlined_call_operand.vmem [shape: f32[1,128], index: 4, kind: input, shape index: {}]   ;;  %s893_s5 = inlined_call_operand.hbm [shape: bf16[128,128], index: 5, kind: input, shape index: {}]   ;;  %s894_s6 = inlined_call_operand.vmem [shape: f32[1,128], index: 6, kind: input, shape index: {}]   ;;  %s895_s7 = inlined_call_operand.hbm [shape: f32[16,128], index: 7, kind: output, shape index: {}]  }
   0x1   :  { %13 = vsyncpa [#allocation6], 0 }
   0x2   :  { %14 = vsyncpa [#allocation9], 0 }
   0x3   :  { %15 = vsyncpa [#allocation4], 0  ;;  %s716_s24 = smov [#allocation5]   ;;  %s598_s28 = scalar_lea.hbm %s889_s1, 1024 }
   0x4   :  { %s33_s25 = sshll.u32 %s716_s24, 4  ;;  %p599_p0 = scmp.ne.s32.totalorder %s889_s1, %s598_s28  ;;  %s34_s25 = int_to_ptr.vmem [resolvable:$true] %s33_s25 }
   0x5   :  { %p602_p1 = scmp.lt.u32.totalorder %s598_s28, %s889_s1 }
   0x7   :  { %p604_p2 = pnand %p602_p1, %p599_p0 }
   0x9   :  { %607 = shalt.err (!%p604_p2)
}
   0xa   :  { %s608_s10 = scalar_lea.vmem %s34_s25, 1024  ;;  %p613_p4 = scmp.lt.s32.totalorder %s34_s25, %s34_s25 }
   0xb   :  { %p609_p3 = scmp.ne.s32.totalorder %s34_s25, %s608_s10  ;;  %p614_p5 = scmp.lt.s32.totalorder %s608_s10, %s608_s10 }
   0xd   :  { %p615_p6 = por %p614_p5, %p613_p4 }
   0xf   :  { %p616_p7 = pnand %p615_p6, %p609_p3 }
  0x11   :  { %619 = shalt.err (!%p616_p7)
}
  0x12   :  { %s717_s11 = smov 64   ;;  %s718_s12 = smov 4  }
  0x13   :  { %39 = dma.hbm_to_vmem [thread:$0]  %s889_s1, 1024, %s34_s25, [#allocation6], %s717_s11, %s717_s11, %s718_s12  }
  0x14   :  { %s719_s15 = smov [#allocation2]   ;;  %s620_s19 = scalar_lea.hbm %s888_s0, 256 }
  0x15   :  { %s21_s16 = sshll.u32 %s719_s15, 4  ;;  %p621_p8 = scmp.ne.s32.totalorder %s888_s0, %s620_s19  ;;  %s22_s16 = int_to_ptr.vmem [resolvable:$true] %s21_s16 }
  0x16   :  { %p624_p9 = scmp.lt.u32.totalorder %s620_s19, %s888_s0 }
  0x18   :  { %p626_p10 = pnand %p624_p9, %p621_p8 }
  0x1a   :  { %629 = shalt.err (!%p626_p10)
}
  0x1b   :  { %s630_s24 = scalar_lea.vmem %s22_s16, 256  ;;  %p635_p12 = scmp.lt.s32.totalorder %s22_s16, %s22_s16 }
  0x1c   :  { %p631_p11 = scmp.ne.s32.totalorder %s22_s16, %s630_s24  ;;  %p636_p13 = scmp.lt.s32.totalorder %s630_s24, %s630_s24 }
  0x1e   :  { %p637_p0 = por %p636_p13, %p635_p12 }
  0x20   :  { %p638_p1 = pnand %p637_p0, %p631_p11 }
  0x22   :  { %641 = shalt.err (!%p638_p1)
}
  0x23   :  { %s720_s1 = smov 128   ;;  %s721_s25 = smov 8  }
  0x24   :  { %27 = dma.hbm_to_vmem [thread:$0]  %s888_s0, 256, %s22_s16, [#allocation3], %s720_s1, %s720_s1, %s721_s25  }
  0x25   :  { %s722_s28 = smov [#allocation7]   ;;  %s723_s30 = smov [#allocation8]  }
  0x26   :  { %s47_s29 = sshll.u32 %s722_s28, 4  ;;  %s61_s8 = sshll.u32 %s723_s30, 4  ;;  %s48_s29 = int_to_ptr.vmem [resolvable:$true] %s47_s29  ;;  %s797_s8 = int_to_ptr.vmem [resolvable:$true] %s61_s8 }
  0x27   :  { %s642_s13 = scalar_lea.hbm %s891_s3, 1024 }
  0x28   :  { %p643_p2 = scmp.ne.s32.totalorder %s891_s3, %s642_s13  ;;  %p646_p3 = scmp.lt.u32.totalorder %s642_s13, %s891_s3 }
  0x2a   :  { %p648_p4 = pnand %p646_p3, %p643_p2 }
  0x2c   :  { %651 = shalt.err (!%p648_p4)
}
  0x2d   :  { %s652_s0 = scalar_lea.vmem %s48_s29, 1024  ;;  %p657_p6 = scmp.lt.s32.totalorder %s48_s29, %s48_s29 }
  0x2e   :  { %p653_p5 = scmp.ne.s32.totalorder %s48_s29, %s652_s0  ;;  %p658_p7 = scmp.lt.s32.totalorder %s652_s0, %s652_s0 }
  0x30   :  { %p659_p8 = por %p658_p7, %p657_p6 }
  0x32   :  { %p660_p9 = pnand %p659_p8, %p653_p5 }
  0x34   :  { %663 = shalt.err (!%p660_p9)
}
  0x35   :  { %53 = dma.hbm_to_vmem [thread:$0]  %s891_s3, 1024, %s48_s29, [#allocation6], %s717_s11, %s717_s11, %s718_s12  }
  0x36   :  { %s664_s22 = scalar_lea.hbm %s893_s5, 1024 }
  0x37   :  { %p665_p10 = scmp.ne.s32.totalorder %s893_s5, %s664_s22  ;;  %p668_p11 = scmp.lt.u32.totalorder %s664_s22, %s893_s5 }
  0x39   :  { %p670_p12 = pnand %p668_p11, %p665_p10 }
  0x3b   :  { %673 = shalt.err (!%p670_p12)
}
  0x3c   :  { %s674_s28 = scalar_lea.vmem %s797_s8, 1024  ;;  %p679_p0 = scmp.lt.s32.totalorder %s797_s8, %s797_s8 }
  0x3d   :  { %p675_p13 = scmp.ne.s32.totalorder %s797_s8, %s674_s28  ;;  %p680_p1 = scmp.lt.s32.totalorder %s674_s28, %s674_s28 }
  0x3f   :  { %p681_p2 = por %p680_p1, %p679_p0 }
  0x41   :  { %p682_p3 = pnand %p681_p2, %p675_p13 }
  0x43   :  { %685 = shalt.err (!%p682_p3)
}
  0x44   :  { %67 = dma.hbm_to_vmem [thread:$0]  %s893_s5, 1024, %s797_s8, [#allocation9], %s717_s11, %s717_s11, %s718_s12  }
  0x45   :  { %708 = dma.done.wait [#allocation3], 256  }
  0x46   :  { %709 = vsyncadd [#allocation3], 4294967040 }
  0x47   :  { %710 = dma.done.wait [#allocation6], 2048  }
  0x48   :  { %711 = vsyncadd [#allocation6], 4294965248 }
  0x49   :  { %712 = dma.done.wait [#allocation9], 1024  }
  0x4a   :  { %713 = vsyncadd [#allocation9], 4294966272  ;;  %v724_v0 = vmov 0.0   ;;  %vm725_vm0 = vmmov 0   ;;  %v574_v1 = vld [vmem:[#allocation5] sm:$0xff]   ;;  %v575_v2 = vld [vmem:[#allocation5 + $0x8] sm:$0xff]  }
  0x4b   :  { %503 = vmatprep.subr.bf16.mxu0 %v724_v0  ;;  %519 = vmatprep.mubr.msk.bf16.mxu0 %vm725_vm0, %v724_v0  ;;  %v576_v3 = vld [vmem:[#allocation5 + $0x10] sm:$0xff]   ;;  %v582_v4 = vld [vmem:[#allocation7] sm:$0xff]   ;;  %v577_v5 = vld [vmem:[#allocation5 + $0x18] sm:$0xff]   ;;  %s726_s9 = smov [#allocation10]  }
  0x4c   :  { %523 = vmatprep.subr.bf16.mxu1 %v724_v0  ;;  %539 = vmatprep.mubr.msk.bf16.mxu1 %vm725_vm0, %v724_v0  ;;  %v583_v6 = vld [vmem:[#allocation7 + $0x8] sm:$0xff]   ;;  %v578_v7 = vld [vmem:[#allocation5 + $0x20] sm:$0xff]   ;;  %v584_v8 = vld [vmem:[#allocation7 + $0x10] sm:$0xff]   ;;  %s435_s10 = sshll.u32 %s726_s9, 4  ;;  %s436_s10 = int_to_ptr.vmem [resolvable:$true] %s435_s10 }
  0x4d   :  { %504 = vmatpush3.bf16.msra.mxu0 %v574_v1  ;;  %524 = vmatpush3.bf16.msra.mxu1 %v582_v4  ;;  %v579_v9 = vld [vmem:[#allocation5 + $0x28] sm:$0xff]   ;;  %v585_v10 = vld [vmem:[#allocation7 + $0x18] sm:$0xff]   ;;  %v580_v11 = vld [vmem:[#allocation5 + $0x30] sm:$0xff]   ;;  %p691_p5 = scmp.lt.s32.totalorder %s436_s10, %s436_s10 }
  0x4e   :  { %505 = vmatprep.subr.bf16.mxu0 %v724_v0  ;;  %525 = vmatprep.subr.bf16.mxu1 %v724_v0  ;;  %v586_v12 = vld [vmem:[#allocation7 + $0x20] sm:$0xff]   ;;  %v581_v13 = vld [vmem:[#allocation5 + $0x38] sm:$0xff]   ;;  %v83_v14 = vld [vmem:[#allocation2] sm:$0xff] }
  0x4f   :  { %v84_v15 = vld [vmem:[#allocation2 + $0x8] sm:$0xff]  ;;  %v587_v16 = vld [vmem:[#allocation7 + $0x28] sm:$0xff]   ;;  %v588_v18 = vld [vmem:[#allocation7 + $0x30] sm:$0xff]  }
  0x50   :  { %v85_v17 = vpack.c.bf16 %v84_v15, %v83_v14  ;;  %v589_v19 = vld [vmem:[#allocation7 + $0x38] sm:$0xff]   ;;  %v590_v20 = vld [vmem:[#allocation8] sm:$0xff]   ;;  %v591_v21 = vld [vmem:[#allocation8 + $0x8] sm:$0xff]  }
  0x51   :  { %506 = vmatpush3.bf16.msra.mxu0 %v575_v2  ;;  %526 = vmatpush3.bf16.msra.mxu1 %v583_v6  ;;  %v592_v22 = vld [vmem:[#allocation8 + $0x10] sm:$0xff]   ;;  %v593_v23 = vld [vmem:[#allocation8 + $0x18] sm:$0xff]   ;;  %v594_v24 = vld [vmem:[#allocation8 + $0x20] sm:$0xff]  }
  0x52   :  { %507 = vmatprep.subr.bf16.mxu0 %v724_v0  ;;  %527 = vmatprep.subr.bf16.mxu1 %v724_v0  ;;  %v595_v25 = vld [vmem:[#allocation8 + $0x28] sm:$0xff]   ;;  %v449_v26 = vld [vmem:[%s890_s2] ss:$0 sm:$0xff]  ;;  %v597_v37 = vld [vmem:[#allocation8 + $0x38] sm:$0xff]  }
  0x53   :  { %v596_v36 = vld [vmem:[#allocation8 + $0x30] sm:$0xff]  }
  0x54   :  { %v458_v38 = vld [vmem:[%s892_s4] ss:$0 sm:$0xff]  ;;  %s686_s4 = scalar_lea.vmem %s436_s10, 256 }
  0x55   :  { %508 = vmatpush3.bf16.msra.mxu0 %v576_v3  ;;  %528 = vmatpush3.bf16.msra.mxu1 %v584_v8  ;;  %v467_v48 = vld [vmem:[%s894_s6] ss:$0 sm:$0xff]  ;;  %p687_p4 = scmp.ne.s32.totalorder %s436_s10, %s686_s4  ;;  %p692_p6 = scmp.lt.s32.totalorder %s686_s4, %s686_s4 }
  0x56   :  { %509 = vmatprep.subr.bf16.mxu0 %v724_v0  ;;  %529 = vmatprep.subr.bf16.mxu1 %v724_v0 }
  0x57   :  { %p693_p7 = por %p692_p6, %p691_p5 }
  0x59   :  { %510 = vmatpush3.bf16.msra.mxu0 %v577_v5  ;;  %530 = vmatpush3.bf16.msra.mxu1 %v585_v10  ;;  %p694_p8 = pnand %p693_p7, %p687_p4 }
  0x5a   :  { %511 = vmatprep.subr.bf16.mxu0 %v724_v0  ;;  %531 = vmatprep.subr.bf16.mxu1 %v724_v0 }
  0x5d   :  { %512 = vmatpush3.bf16.msra.mxu0 %v578_v7  ;;  %532 = vmatpush3.bf16.msra.mxu1 %v586_v12 }
  0x5e   :  { %513 = vmatprep.subr.bf16.mxu0 %v724_v0  ;;  %533 = vmatprep.subr.bf16.mxu1 %v724_v0 }
  0x61   :  { %514 = vmatpush3.bf16.msra.mxu0 %v579_v9  ;;  %534 = vmatpush3.bf16.msra.mxu1 %v587_v16 }
  0x62   :  { %515 = vmatprep.subr.bf16.mxu0 %v724_v0  ;;  %535 = vmatprep.subr.bf16.mxu1 %v724_v0 }
  0x65   :  { %516 = vmatpush3.bf16.msra.mxu0 %v580_v11  ;;  %536 = vmatpush3.bf16.msra.mxu1 %v588_v18 }
  0x66   :  { %517 = vmatprep.subr.bf16.mxu0 %v724_v0  ;;  %537 = vmatprep.subr.bf16.mxu1 %v724_v0 }
  0x69   :  { %518 = vmatpush3.bf16.msra.mxu0 %v581_v13  ;;  %538 = vmatpush3.bf16.msra.mxu1 %v589_v19 }
  0x6a   :  { %543 = vmatprep.subr.bf16.mxu0 %v724_v0 }
  0x6c   :  { %520 = vmatmul.mubr.bf16.vlgmr.msra.gmra.mrb[0].mxu0 %v85_v17 }
  0x6d   :  { %559 = vmatprep.mubr.msk.bf16.mxu0 %vm725_vm0, %v724_v0  ;;  %544 = vmatpush3.bf16.msra.mxu0 %v590_v20 }
  0x6e   :  { %545 = vmatprep.subr.bf16.mxu0 %v724_v0 }
  0x71   :  { %546 = vmatpush3.bf16.msra.mxu0 %v591_v21 }
  0x72   :  { %547 = vmatprep.subr.bf16.mxu0 %v724_v0 }
  0x75   :  { %548 = vmatpush3.bf16.msra.mxu0 %v592_v22 }
  0x76   :  { %549 = vmatprep.subr.bf16.mxu0 %v724_v0 }
  0x79   :  { %550 = vmatpush3.bf16.msra.mxu0 %v593_v23 }
  0x7a   :  { %551 = vmatprep.subr.bf16.mxu0 %v724_v0 }
  0x7d   :  { %552 = vmatpush3.bf16.msra.mxu0 %v594_v24 }
  0x7e   :  { %553 = vmatprep.subr.bf16.mxu0 %v724_v0 }
  0x81   :  { %554 = vmatpush3.bf16.msra.mxu0 %v595_v25 }
  0x82   :  { %555 = vmatprep.subr.bf16.mxu0 %v724_v0 }
  0x85   :  { %556 = vmatpush3.bf16.msra.mxu0 %v596_v36 }
  0x86   :  { %557 = vmatprep.subr.bf16.mxu0 %v724_v0 }
  0x89   :  { %558 = vmatpush3.bf16.msra.mxu0 %v597_v37 }
 0x13f   :  { %v191_v27 = vpop.f32.mrb[0].mxu0 }
 0x140   :  { %v192_v28 = vadd.f32 %v449_v26, %v191_v27  ;;  %v521_v29 = vpop.f32.mrb[1].mxu0 }
 0x141   :  { %v194_v30 = vpop.f32.mrb[2].mxu0 }
 0x142   :  { %v195_v31 = vadd.f32 %v449_v26, %v194_v30  ;;  %v522_v32 = vpop.f32.mrb[3].mxu0  ;;  %v198_v33 = vmax.f32 %v192_v28, 0.0 }
 0x144   :  { %v199_v34 = vmax.f32 %v195_v31, 0.0 }
 0x146   :  { %v200_v35 = vpack.c.bf16 %v199_v34, %v198_v33 }
 0x148   :  { %540 = vmatmul.mubr.bf16.vlgmr.msra.gmra.mrb[0].mxu1 %v200_v35 }
 0x21b   :  { %v306_v39 = vpop.f32.mrb[0].mxu1 }
 0x21c   :  { %v307_v40 = vadd.f32 %v458_v38, %v306_v39  ;;  %v541_v41 = vpop.f32.mrb[1].mxu1 }
 0x21d   :  { %v309_v42 = vpop.f32.mrb[2].mxu1 }
 0x21e   :  { %v310_v43 = vadd.f32 %v458_v38, %v309_v42  ;;  %v542_v44 = vpop.f32.mrb[3].mxu1  ;;  %v313_v45 = vmax.f32 %v307_v40, 0.0 }
 0x220   :  { %v314_v46 = vmax.f32 %v310_v43, 0.0 }
 0x222   :  { %v315_v47 = vpack.c.bf16 %v314_v46, %v313_v45 }
 0x224   :  { %560 = vmatmul.mubr.bf16.vlgmr.msra.gmra.mrb[4].mxu0 %v315_v47 }
 0x2f7   :  { %v421_v49 = vpop.f32.mrb[4].mxu0 }
 0x2f8   :  { %v422_v50 = vadd.f32 %v467_v48, %v421_v49  ;;  %v561_v51 = vpop.f32.mrb[5].mxu0 }
 0x2f9   :  { %v424_v52 = vpop.f32.mrb[6].mxu0 }
 0x2fa   :  { %428 = vst [vmem:[#allocation10] sm:$0xff] %v422_v50  ;;  %v425_v53 = vadd.f32 %v467_v48, %v424_v52  ;;  %v562_v54 = vpop.f32.mrb[7].mxu0 }
 0x2fc   :  { %429 = vst [vmem:[#allocation10 + $0x8] sm:$0xff] %v425_v53 }
 0x2fd   :  { %697 = shalt.err (!%p694_p8)
}
 0x2fe   :  { %s698_s14 = scalar_lea.hbm %s895_s7, 256 }
 0x2ff   :  { %p699_p9 = scmp.ne.s32.totalorder %s895_s7, %s698_s14  ;;  %p702_p10 = scmp.lt.u32.totalorder %s698_s14, %s895_s7 }
 0x301   :  { %p704_p11 = pnand %p702_p10, %p699_p9 }
 0x303   :  { %707 = shalt.err (!%p704_p11)
}
 0x304   :  { %441 = dma.vmem_to_hbm [thread:$0]  %s436_s10, 256, %s895_s7, [#allocation4], %s720_s1, %s720_s1, %s721_s25  }
 0x305   :  { %714 = dma.done.wait [#allocation4], 256  }
 0x306   :  { %715 = vsyncadd [#allocation4], 4294967040 }
 0x307   :  { %445 = vsyncpa [#allocation3], 1 }
 0x308   :  { %446 = vsyncpa [#allocation6], 1 }
 0x309   :  { %447 = vsyncpa [#allocation9], 1 }
 0x30a   :  { %448 = vsyncpa [#allocation4], 1 }

</bundles_post_ra>
